<compile_context>
chip_gen: v6e
topology: v6e:2x2x1
jax: 0.10.0
libtpu: 0.0.40
codegen_flags: <defaults>
</compile_context>

<pallas_src>
import jax
import jax.numpy as jnp
from jax import lax
from jax.experimental import pallas as pl
from jax.experimental.pallas import tpu as pltpu


def _round_up(x, m):
    return (x + m - 1) // m * m


def _pick_tiles(M, Kp, Cp, *, tm_cap=512, tk_cap=2048, min_m_steps=16,
                vmem_budget=40 << 20):
    """Pick the M (lane) tile and K tile.

    TM: multiple of 128; shrunk so the parallel grid axis has enough depth for
        megacore sharding / pipeline overlap (>= min_m_steps when possible).
    TK: multiple of 128 dividing Kp; shrunk (adding K grid steps, accumulated
        in scratch) if double-buffered blocks would exceed the VMEM budget
        (kept v7x-safe: 64 MiB physical VMEM there).
    """
    tm = tm_cap
    while tm > 128 and -(-M // tm) < min_m_steps:
        tm //= 2

    tk = max(128, min(Kp, tk_cap) // 128 * 128)
    while Kp % tk:
        tk -= 128

    def vmem_need(tm_, tk_):
        a_blk = 4 * tk_ * tm_ * 2          # bf16 A block
        w_blk = Cp * tk_ * 2               # bf16 weight block
        o_blk = Cp * tm_ * 2               # bf16 output block
        s_blk = Cp * 1 * 4                 # f32 shift block
        acc = 4 * Cp * tm_ * 4             # f32 accumulator scratch
        return 2 * (a_blk + w_blk + o_blk + s_blk) + acc

    while vmem_need(tm, tk) > vmem_budget:
        if tk > 128:
            tk = max(128, (tk // 2) // 128 * 128)
            while Kp % tk:
                tk -= 128
        elif tm > 128:
            tm //= 2
        else:
            break
    return tm, tk, vmem_need(tm, tk)


def _stcnn_kernel(a_ref, w_ref, shift_ref, o_ref, acc_ref):
    # a_ref    : (4, TK, TM)  bf16 -- 4 max-pool candidates; K slice x M tile
    #                                 (M = pooled output position, lane axis)
    # w_ref    : (Cp, TK)     bf16 -- conv weight (BN scale pre-folded), K slice
    # shift_ref: (Cp, 1)      f32  -- BN shift (beta - mean*scale)
    # o_ref    : (Cp, TM)     bf16 -- lane-dense output tile
    # acc_ref  : (4, Cp, TM)  f32  -- per-candidate accumulators across K steps
    k = pl.program_id(1)

    @pl.when(k == 0)
    def _():
        acc_ref[...] = jnp.zeros_like(acc_ref)

    w = w_ref[...]
    for p in range(a_ref.shape[0]):            # short, statically unrolled
        acc_ref[p] += jnp.dot(w, a_ref[p], preferred_element_type=jnp.float32)

    @pl.when(k == pl.num_programs(1) - 1)
    def _():
        pooled = acc_ref[0]
        for p in range(1, acc_ref.shape[0]):
            pooled = jnp.maximum(pooled, acc_ref[p])      # 2x2 spatial max-pool
        # BN shift + ReLU commute with the max (monotone, shift shared by the
        # 4 candidates), so they run once on the pooled result.
        o_ref[...] = jnp.maximum(pooled + shift_ref[...], 0.0).astype(o_ref.dtype)


def stcnn_forward(x, weight, gamma, beta, running_mean, running_var,
                  *, stride=(1, 1, 1), padding=(1, 1, 1), eps=1e-5,
                  out_dtype=jnp.bfloat16):
    N, Cin, D, H, W = x.shape
    Cout, Cin_w, Kd, Kh, Kw = weight.shape
    assert Cin == Cin_w
    sd, sh, sw = stride
    pd, ph, pw = padding
    Dout = (D + 2 * pd - Kd) // sd + 1
    Hout = (H + 2 * ph - Kh) // sh + 1
    Wout = (W + 2 * pw - Kw) // sw + 1
    Ho2, Wo2 = Hout // 2, Wout // 2       # MaxPool3d((1,2,2),(1,2,2)) floors

    if Dout <= 0 or Ho2 <= 0 or Wo2 <= 0:  # degenerate: empty pooled output
        return jnp.zeros((N, Cout, max(Dout, 0), max(Ho2, 0), max(Wo2, 0)),
                         out_dtype)

    K = Cin * Kd * Kh * Kw
    KK = Kd * Kh * Kw
    M = N * Dout * Ho2 * Wo2

    # ---- im2col (host-side glue), entirely in bf16 -------------------------
    # TODO(synk): replace with in-kernel halo-DMA patch formation to remove
    # the ~27x read inflation of A (bf16 already halves the bytes).
    xb = x.astype(jnp.bfloat16)
    xp = jnp.pad(xb, ((0, 0), (0, 0), (pd, pd), (ph, ph), (pw, pw)))
    cols = []
    for kd in range(Kd):
        for kh in range(Kh):
            for kw in range(Kw):
                cols.append(xp[:, :,
                               kd:kd + sd * Dout:sd,
                               kh:kh + sh * Hout:sh,
                               kw:kw + sw * Wout:sw])      # (N, Cin, Do, Ho, Wo)
    patches = jnp.stack(cols, axis=0)                      # (KK, N, Cin, Do, Ho, Wo)
    patches = patches[:, :, :, :, :Ho2 * 2, :Wo2 * 2]      # drop odd pool edges
    patches = patches.reshape(KK, N, Cin, Dout, Ho2, 2, Wo2, 2)
    # -> (dh, dw, Cin, KK, N, Do, Ho2, Wo2): pool candidate leading, K next,
    #    pooled output position (M) last so M lands on the kernel's lane axis.
    A = patches.transpose(5, 7, 2, 0, 1, 3, 4, 6).reshape(4, K, M)

    # Fold BN scale into the weight rows; keep only +shift in-kernel.
    scale = gamma / jnp.sqrt(running_var + eps)
    shift = (beta - running_mean * scale).astype(jnp.float32)
    WT = weight.reshape(Cout, K).astype(jnp.float32) * scale[:, None]   # (Cout, K)

    # ---- padding / tiling ---------------------------------------------------
    # Cout sits on the sublane axis (pad to 16, not 128) -> no 16x padded-write
    # waste for small Cout; K and M pad to lane-aligned multiples of 128.
    Cp = max(16, _round_up(Cout, 16))
    Kp = _round_up(K, 128)
    TM, TK, vmem_need = _pick_tiles(M, Kp, Cp)
    Mp = _round_up(M, TM)

    A = jnp.pad(A, ((0, 0), (0, Kp - K), (0, Mp - M)))                  # bf16
    WT = jnp.pad(WT, ((0, Cp - Cout), (0, Kp - K))).astype(jnp.bfloat16)
    shift = jnp.pad(shift, (0, Cp - Cout)).reshape(Cp, 1)

    grid = (Mp // TM, Kp // TK)
    vmem_limit = max(32 << 20, min(vmem_need + (8 << 20), 48 << 20))

    out = pl.pallas_call(
        _stcnn_kernel,
        out_shape=jax.ShapeDtypeStruct((Cp, Mp), out_dtype),
        grid_spec=pltpu.PrefetchScalarGridSpec(
            num_scalar_prefetch=0,
            grid=grid,
            in_specs=[
                pl.BlockSpec((4, TK, TM), lambda m, k: (0, k, m)),
                # W / shift block indices are constant in m, so the pipeliner
                # only re-fetches them on k changes; the spare second buffer is
                # small.  TODO(synk): single-buffer via pl.Buffered(1) once
                # verified on the target toolchain.
                pl.BlockSpec((Cp, TK), lambda m, k: (0, k)),
                pl.BlockSpec((Cp, 1), lambda m, k: (0, 0)),
            ],
            out_specs=pl.BlockSpec((Cp, TM), lambda m, k: (0, m)),
            scratch_shapes=[pltpu.VMEM((4, Cp, TM), jnp.float32)],
        ),
        compiler_params=pltpu.CompilerParams(
            dimension_semantics=("parallel", "arbitrary"),
            vmem_limit_bytes=vmem_limit),
    )(A, WT, shift)

    out = out[:Cout, :M]                                    # strip padding
    y = out.reshape(Cout, N, Dout, Ho2, Wo2).transpose(1, 0, 2, 3, 4)
    return y                                                # (N, Cout, Do, Ho2, Wo2)


def _reference(x, weight, gamma, beta, rm, rv, eps=1e-5):
    # Mirrors the kernel's bf16 input quantization (BN scale folded into the
    # weights, both matmul operands rounded to bf16, f32 accumulation) so the
    # comparison isolates kernel errors from the intended quantization.
    scale = gamma / jnp.sqrt(rv + eps)
    shift = beta - rm * scale
    w_s = (weight * scale[:, None, None, None, None]
           ).astype(jnp.bfloat16).astype(jnp.float32)
    x_b = x.astype(jnp.bfloat16).astype(jnp.float32)
    y = lax.conv_general_dilated(
        x_b, w_s, window_strides=(1, 1, 1), padding=[(1, 1)] * 3,
        dimension_numbers=("NCDHW", "OIDHW", "NCDHW"),
        precision=lax.Precision.HIGHEST)
    y = y + shift[None, :, None, None, None]
    y = jnp.maximum(y, 0.0)
    n, c, d, h, w = y.shape
    return y.reshape(n, c, d, h // 2, 2, w // 2, 2).max(axis=(4, 6))


if __name__ == "__main__":
    key = jax.random.PRNGKey(0)
    kx, kw = jax.random.split(key)

    N, Cin, Cout = 2, 4, 8
    D, H, W = 8, 16, 16

    x = jax.random.normal(kx, (N, Cin, D, H, W), dtype=jnp.float32)
    weight = 0.1 * jax.random.normal(kw, (Cout, Cin, 3, 3, 3), dtype=jnp.float32)
    gamma = 1.0 + 0.1 * jnp.arange(Cout, dtype=jnp.float32)
    beta = 0.05 * jnp.arange(Cout, dtype=jnp.float32)
    running_mean = 0.02 * jnp.arange(Cout, dtype=jnp.float32)
    running_var = 1.0 + 0.03 * jnp.arange(Cout, dtype=jnp.float32)

    out = stcnn_forward(x, weight, gamma, beta, running_mean, running_var)
    out = jax.block_until_ready(out)

    ref = _reference(x, weight, gamma, beta, running_mean, running_var)
    assert out.shape == (N, Cout, D, H // 2, W // 2), out.shape
    out_f32 = out.astype(jnp.float32)
    max_err = float(jnp.max(jnp.abs(out_f32 - ref)))
    # bf16 output store adds ~2^-9 relative rounding on top of bf16 inputs.
    assert jnp.allclose(out_f32, ref, atol=2e-2, rtol=2e-2), max_err

    print("KERNEL_OK")
</pallas_src>

<mosaic_0001>
module attributes {stable_mosaic.version = 11 : i64} {
  func.func @_stcnn_kernel(%arg0: i32, %arg1: i32, %arg2: memref<4x128x128xbf16, #tpu.memory_space<vmem>>, %arg3: memref<16x128xbf16, #tpu.memory_space<vmem>>, %arg4: memref<16x1xf32, #tpu.memory_space<vmem>>, %arg5: memref<16x128xbf16, #tpu.memory_space<vmem>>, %arg6: memref<4x16x128xf32, #tpu.memory_space<vmem>>) attributes {dimension_semantics = [#tpu.dimension_semantics<parallel>, #tpu.dimension_semantics<arbitrary>], iteration_bounds = array<i64: 8, 1>, scalar_prefetch = 0 : i64, scratch_operands = 1 : i64, tpu.core_type = #tpu.core_type<tc>, window_params = [{transform_indices = @transform_0, window_bounds = array<i64: 4, 128, 128>}, {transform_indices = @transform_1, window_bounds = array<i64: 16, 128>}, {pipeline_mode = #tpu.pipeline_mode<synchronous>, transform_indices = @transform_2, window_bounds = array<i64: 16, 1>}, {transform_indices = @transform_3, window_bounds = array<i64: 16, 128>}]} {
    %c0_i32 = arith.constant 0 : i32
    %0 = arith.cmpi eq, %arg1, %c0_i32 : i32
    %1 = arith.extui %0 : i1 to i32
    %c0_i32_0 = arith.constant 0 : i32
    %2 = arith.cmpi ne, %1, %c0_i32_0 : i32
    scf.if %2 {
      %cst_40 = arith.constant 0.000000e+00 : f32
      %43 = vector.broadcast %cst_40 : f32 to vector<4x16x128xf32>
      %c0_41 = arith.constant 0 : index
      %c0_42 = arith.constant 0 : index
      %c0_43 = arith.constant 0 : index
      %44 = vector.load %arg6[%c0_41, %c0_42, %c0_43] : memref<4x16x128xf32, #tpu.memory_space<vmem>>, vector<4x16x128xf32>
      tpu.vector_store %arg6[%c0_41, %c0_42, %c0_43], %43 {strides = array<i32>} : memref<4x16x128xf32, #tpu.memory_space<vmem>>, vector<4x16x128xf32>,
    } else {
    }
    %c0 = arith.constant 0 : index
    %c0_1 = arith.constant 0 : index
    %3 = vector.load %arg3[%c0, %c0_1] : memref<16x128xbf16, #tpu.memory_space<vmem>>, vector<16x128xbf16>
    %c0_2 = arith.constant 0 : index
    %c0_3 = arith.constant 0 : index
    %c0_4 = arith.constant 0 : index
    %4 = vector.load %arg6[%c0_2, %c0_3, %c0_4] : memref<4x16x128xf32, #tpu.memory_space<vmem>>, vector<1x16x128xf32>
    %5 = vector.shape_cast %4 : vector<1x16x128xf32> to vector<16x128xf32>
    %c0_5 = arith.constant 0 : index
    %c0_6 = arith.constant 0 : index
    %c0_7 = arith.constant 0 : index
    %6 = vector.load %arg2[%c0_5, %c0_6, %c0_7] : memref<4x128x128xbf16, #tpu.memory_space<vmem>>, vector<1x128x128xbf16>
    %7 = vector.shape_cast %6 : vector<1x128x128xbf16> to vector<128x128xbf16>
    %cst = arith.constant dense<0.000000e+00> : vector<16x128xf32>
    %8 = tpu.matmul %3, %7, %cst {dimension_numbers = #tpu.dot_dimension_numbers<[1], [0], [0], [1], [0, 0, 1, 1], [], []>} : vector<16x128xbf16>, vector<128x128xbf16>, vector<16x128xf32> -> vector<16x128xf32>
    %9 = arith.addf %5, %8 : vector<16x128xf32>
    %c0_8 = arith.constant 0 : index
    %c0_9 = arith.constant 0 : index
    %c0_10 = arith.constant 0 : index
    %10 = vector.load %arg6[%c0_8, %c0_9, %c0_10] : memref<4x16x128xf32, #tpu.memory_space<vmem>>, vector<1x16x128xf32>
    %11 = vector.shape_cast %10 : vector<1x16x128xf32> to vector<16x128xf32>
    %12 = vector.shape_cast %9 : vector<16x128xf32> to vector<1x16x128xf32>
    tpu.vector_store %arg6[%c0_8, %c0_9, %c0_10], %12 {strides = array<i32>} : memref<4x16x128xf32, #tpu.memory_space<vmem>>, vector<1x16x128xf32>,
    %c1 = arith.constant 1 : index
    %c0_11 = arith.constant 0 : index
    %c0_12 = arith.constant 0 : index
    %13 = vector.load %arg6[%c1, %c0_11, %c0_12] : memref<4x16x128xf32, #tpu.memory_space<vmem>>, vector<1x16x128xf32>
    %14 = vector.shape_cast %13 : vector<1x16x128xf32> to vector<16x128xf32>
    %c1_13 = arith.constant 1 : index
    %c0_14 = arith.constant 0 : index
    %c0_15 = arith.constant 0 : index
    %15 = vector.load %arg2[%c1_13, %c0_14, %c0_15] : memref<4x128x128xbf16, #tpu.memory_space<vmem>>, vector<1x128x128xbf16>
    %16 = vector.shape_cast %15 : vector<1x128x128xbf16> to vector<128x128xbf16>
    %cst_16 = arith.constant dense<0.000000e+00> : vector<16x128xf32>
    %17 = tpu.matmul %3, %16, %cst_16 {dimension_numbers = #tpu.dot_dimension_numbers<[1], [0], [0], [1], [0, 0, 1, 1], [], []>} : vector<16x128xbf16>, vector<128x128xbf16>, vector<16x128xf32> -> vector<16x128xf32>
    %18 = arith.addf %14, %17 : vector<16x128xf32>
    %c1_17 = arith.constant 1 : index
    %c0_18 = arith.constant 0 : index
    %c0_19 = arith.constant 0 : index
    %19 = vector.load %arg6[%c1_17, %c0_18, %c0_19] : memref<4x16x128xf32, #tpu.memory_space<vmem>>, vector<1x16x128xf32>
    %20 = vector.shape_cast %19 : vector<1x16x128xf32> to vector<16x128xf32>
    %21 = vector.shape_cast %18 : vector<16x128xf32> to vector<1x16x128xf32>
    tpu.vector_store %arg6[%c1_17, %c0_18, %c0_19], %21 {strides = array<i32>} : memref<4x16x128xf32, #tpu.memory_space<vmem>>, vector<1x16x128xf32>,
    %c2 = arith.constant 2 : index
    %c0_20 = arith.constant 0 : index
    %c0_21 = arith.constant 0 : index
    %22 = vector.load %arg6[%c2, %c0_20, %c0_21] : memref<4x16x128xf32, #tpu.memory_space<vmem>>, vector<1x16x128xf32>
    %23 = vector.shape_cast %22 : vector<1x16x128xf32> to vector<16x128xf32>
    %c2_22 = arith.constant 2 : index
    %c0_23 = arith.constant 0 : index
    %c0_24 = arith.constant 0 : index
    %24 = vector.load %arg2[%c2_22, %c0_23, %c0_24] : memref<4x128x128xbf16, #tpu.memory_space<vmem>>, vector<1x128x128xbf16>
    %25 = vector.shape_cast %24 : vector<1x128x128xbf16> to vector<128x128xbf16>
    %cst_25 = arith.constant dense<0.000000e+00> : vector<16x128xf32>
    %26 = tpu.matmul %3, %25, %cst_25 {dimension_numbers = #tpu.dot_dimension_numbers<[1], [0], [0], [1], [0, 0, 1, 1], [], []>} : vector<16x128xbf16>, vector<128x128xbf16>, vector<16x128xf32> -> vector<16x128xf32>
    %27 = arith.addf %23, %26 : vector<16x128xf32>
    %c2_26 = arith.constant 2 : index
    %c0_27 = arith.constant 0 : index
    %c0_28 = arith.constant 0 : index
    %28 = vector.load %arg6[%c2_26, %c0_27, %c0_28] : memref<4x16x128xf32, #tpu.memory_space<vmem>>, vector<1x16x128xf32>
    %29 = vector.shape_cast %28 : vector<1x16x128xf32> to vector<16x128xf32>
    %30 = vector.shape_cast %27 : vector<16x128xf32> to vector<1x16x128xf32>
    tpu.vector_store %arg6[%c2_26, %c0_27, %c0_28], %30 {strides = array<i32>} : memref<4x16x128xf32, #tpu.memory_space<vmem>>, vector<1x16x128xf32>,
    %c3 = arith.constant 3 : index
    %c0_29 = arith.constant 0 : index
    %c0_30 = arith.constant 0 : index
    %31 = vector.load %arg6[%c3, %c0_29, %c0_30] : memref<4x16x128xf32, #tpu.memory_space<vmem>>, vector<1x16x128xf32>
    %32 = vector.shape_cast %31 : vector<1x16x128xf32> to vector<16x128xf32>
    %c3_31 = arith.constant 3 : index
    %c0_32 = arith.constant 0 : index
    %c0_33 = arith.constant 0 : index
    %33 = vector.load %arg2[%c3_31, %c0_32, %c0_33] : memref<4x128x128xbf16, #tpu.memory_space<vmem>>, vector<1x128x128xbf16>
    %34 = vector.shape_cast %33 : vector<1x128x128xbf16> to vector<128x128xbf16>
    %cst_34 = arith.constant dense<0.000000e+00> : vector<16x128xf32>
    %35 = tpu.matmul %3, %34, %cst_34 {dimension_numbers = #tpu.dot_dimension_numbers<[1], [0], [0], [1], [0, 0, 1, 1], [], []>} : vector<16x128xbf16>, vector<128x128xbf16>, vector<16x128xf32> -> vector<16x128xf32>
    %36 = arith.addf %32, %35 : vector<16x128xf32>
    %c3_35 = arith.constant 3 : index
    %c0_36 = arith.constant 0 : index
    %c0_37 = arith.constant 0 : index
    %37 = vector.load %arg6[%c3_35, %c0_36, %c0_37] : memref<4x16x128xf32, #tpu.memory_space<vmem>>, vector<1x16x128xf32>
    %38 = vector.shape_cast %37 : vector<1x16x128xf32> to vector<16x128xf32>
    %39 = vector.shape_cast %36 : vector<16x128xf32> to vector<1x16x128xf32>
    tpu.vector_store %arg6[%c3_35, %c0_36, %c0_37], %39 {strides = array<i32>} : memref<4x16x128xf32, #tpu.memory_space<vmem>>, vector<1x16x128xf32>,
    %c0_i32_38 = arith.constant 0 : i32
    %40 = arith.cmpi eq, %arg1, %c0_i32_38 : i32
    %41 = arith.extui %40 : i1 to i32
    %c0_i32_39 = arith.constant 0 : i32
    %42 = arith.cmpi ne, %41, %c0_i32_39 : i32
    scf.if %42 {
      %c0_40 = arith.constant 0 : index
      %c0_41 = arith.constant 0 : index
      %c0_42 = arith.constant 0 : index
      %43 = vector.load %arg6[%c0_40, %c0_41, %c0_42] : memref<4x16x128xf32, #tpu.memory_space<vmem>>, vector<1x16x128xf32>
      %44 = vector.shape_cast %43 : vector<1x16x128xf32> to vector<16x128xf32>
      %c1_43 = arith.constant 1 : index
      %c0_44 = arith.constant 0 : index
      %c0_45 = arith.constant 0 : index
      %45 = vector.load %arg6[%c1_43, %c0_44, %c0_45] : memref<4x16x128xf32, #tpu.memory_space<vmem>>, vector<1x16x128xf32>
      %46 = vector.shape_cast %45 : vector<1x16x128xf32> to vector<16x128xf32>
      %47 = arith.maximumf %44, %46 : vector<16x128xf32>
      %c2_46 = arith.constant 2 : index
      %c0_47 = arith.constant 0 : index
      %c0_48 = arith.constant 0 : index
      %48 = vector.load %arg6[%c2_46, %c0_47, %c0_48] : memref<4x16x128xf32, #tpu.memory_space<vmem>>, vector<1x16x128xf32>
      %49 = vector.shape_cast %48 : vector<1x16x128xf32> to vector<16x128xf32>
      %50 = arith.maximumf %47, %49 : vector<16x128xf32>
      %c3_49 = arith.constant 3 : index
      %c0_50 = arith.constant 0 : index
      %c0_51 = arith.constant 0 : index
      %51 = vector.load %arg6[%c3_49, %c0_50, %c0_51] : memref<4x16x128xf32, #tpu.memory_space<vmem>>, vector<1x16x128xf32>
      %52 = vector.shape_cast %51 : vector<1x16x128xf32> to vector<16x128xf32>
      %53 = arith.maximumf %50, %52 : vector<16x128xf32>
      %c0_52 = arith.constant 0 : index
      %c0_53 = arith.constant 0 : index
      %54 = vector.load %arg4[%c0_52, %c0_53] : memref<16x1xf32, #tpu.memory_space<vmem>>, vector<16x1xf32>
      %55 = vector.broadcast %54 : vector<16x1xf32> to vector<16x128xf32>
      %56 = arith.addf %53, %55 : vector<16x128xf32>
      %cst_54 = arith.constant 0.000000e+00 : f32
      %57 = vector.broadcast %cst_54 : f32 to vector<16x128xf32>
      %58 = arith.maximumf %56, %57 : vector<16x128xf32>
      %59 = arith.truncf %58 : vector<16x128xf32> to vector<16x128xbf16>
      %c0_55 = arith.constant 0 : index
      %c0_56 = arith.constant 0 : index
      %60 = vector.load %arg5[%c0_55, %c0_56] : memref<16x128xbf16, #tpu.memory_space<vmem>>, vector<16x128xbf16>
      tpu.vector_store %arg5[%c0_55, %c0_56], %59 {strides = array<i32>} : memref<16x128xbf16, #tpu.memory_space<vmem>>, vector<16x128xbf16>,
    } else {
    }
    return
  }
  func.func @transform_0(%arg0: i32, %arg1: i32) -> (i32, i32, i32) {
    %c0_i32 = arith.constant 0 : i32
    %c0_i32_0 = arith.constant 0 : i32
    return %c0_i32, %arg1, %arg0 : i32, i32, i32
  }
  func.func @transform_1(%arg0: i32, %arg1: i32) -> (i32, i32) {
    %c0_i32 = arith.constant 0 : i32
    %c0_i32_0 = arith.constant 0 : i32
    return %c0_i32, %arg1 : i32, i32
  }
  func.func @transform_2(%arg0: i32, %arg1: i32) -> (i32, i32) {
    %c0_i32 = arith.constant 0 : i32
    %c0_i32_0 = arith.constant 0 : i32
    %c0_i32_1 = arith.constant 0 : i32
    return %c0_i32, %c0_i32_0 : i32, i32
  }
  func.func @transform_3(%arg0: i32, %arg1: i32) -> (i32, i32) {
    %c0_i32 = arith.constant 0 : i32
    %c0_i32_0 = arith.constant 0 : i32
    return %c0_i32, %arg0 : i32, i32
  }
}

</mosaic_0001>

<bundles_post_ra>
// kernel: tpu_custom_call.1
= control target key start
LH: loop header
LB: loop body
LE: loop exit
PB: predicated region body
PF: predicated region fallthrough
CT: control target
= control target key end

     0   :  { %8 = vsyncpa [#allocation4], 0  ;;  %s1540_s0 = inlined_call_operand.hbm [shape: bf16[4,128,1024], index: 0, kind: input, shape index: {}]   ;;  %s1541_s1 = inlined_call_operand.vmem [shape: bf16[16,128], index: 1, kind: input, shape index: {}]   ;;  %s1542_s2 = inlined_call_operand.vmem [shape: f32[16,1], index: 2, kind: input, shape index: {}]   ;;  %s1543_s3 = inlined_call_operand.hbm [shape: bf16[16,1024], index: 3, kind: output, shape index: {}]  }
   0x1   :  { %10 = vsyncpa [#allocation4 + $0x1], 0 }
   0x2   :  { %11 = vsyncpa [#allocation5], 0 }
   0x3   :  { %13 = vsyncpa [#allocation5 + $0x1], 0  ;;  %s1314_s12 = smov 0   ;;  %s1316_s13 = smov 0  }
   0x4   :  { %s1318_s14 = smov 0   ;;  %s1320_s15 = smov 0  }
   0x5   :  { %s1322_s16 = smov 0   ;;  %s1324_s17 = smov 0  }
   0x6 LB: > { %s848_s18 = sadd.s32 4294967295, %s1281_s17   ;;  %s849_s19 = sadd.s32 4294967294, %s1281_s17   ;;  %s1281_s17 = sphi %s1324_s17, %s19_s17   ;;  %s1277_s16 = sphi %s1322_s16, %s1553_s16   ;;  %s1273_s15 = sphi %s1320_s15, %s1552_s15   ;;  %s1269_s14 = sphi %s1318_s14, %s1551_s14   ;;  %s1265_s13 = sphi %s1316_s13, %s1550_s13   ;;  %s1261_s12 = sphi %s1314_s12, %s1549_s12  }
   0x7   : > { %s31_s20 = sadd.s32 1, %s1277_s16  ;;  %s40_s21 = sadd.s32 1, %s1269_s14 }
   0x8   : > { %p33_p0 = scmp.ge.s32.totalorder %s31_s20, 8  ;;  %p47_p1 = scmp.ne.s32.totalorder %s1269_s14, %s1265_s13 }
   0x9   : > { %p48_p2 = scmp.eq.s32.totalorder %s1281_s17, 0  ;;  %p53_p3 = scmp.ne.s32.totalorder %s1265_s13, %s1261_s12 }
   0xa   : > { %s1555_s20 = smov (%p33_p0, %s31_s20), 0  ;;  %p54_p5 = scmp.eq.s32.totalorder %s848_s18, 0 }
   0xb   : > { %p1355_p4 = por %p48_p2, %p47_p1  ;;  %s36_s23 = ssub.s32 %s1277_s16, %s1555_s20 }
   0xc   : > { %p124_p6 = scmp.eq.s32.totalorder %s848_s18, 7  ;;  %p38_p7 = scmp.eq.s32.totalorder %s36_s23, 0 }
   0xd   : > { %p1361_p8 = por %p54_p5, %p53_p3  ;;  %p130_p10 = scmp.eq.s32.totalorder %s849_s19, 7 }
   0xe   : > { %p1365_p9 = por %p124_p6, %p47_p1  ;;  %p1080_p12 = scmp.lt.s32.totalorder %s1281_s17, 8 }
   0xf   : > { %s1370_s26 = scalar_select %p38_p7, %s1269_s14, %s40_s21  }
  0x10   : > { %p1372_p11 = por %p130_p10, %p53_p3  ;;  %s160_s28 = sand.u32 1, %s1269_s14  }
  0x11   : > { %s853_s29 = sshll.u32 %s160_s28, 8  ;;  %s854_s30 = sshll.u32 %s1277_s16, 6 }
  0x12   : > { %s172_s6 = scalar_lea.hbm %s1540_s0, %s854_s30  ;;  %s164_s7 = scalar_lea.vmem [#allocation3], %s853_s29 }
  0x13   : > { %s173_s8 = sshll.u32 %s164_s7, 4  ;;  %p1384_p13 = pnand %p1080_p12, %p1355_p4  ;;  %s174_s8 = int_to_ptr.vmem [resolvable:$true] %s173_s8 }
  0x14   : > { %s161_s10 = scalar_lea.sflag [#allocation4], %s160_s28  ;;  %s1186_s11 = scalar_lea.vmem %s174_s8, 4096 }
  0x15   : > { %p1175_p0 = pneg %p1384_p13  ;;  %p1187_p1 = scmp.ne.s32.totalorder %s174_s8, %s1186_s11 }
  0x16   : > { %s1283_s18 = smov [#allocation3]  }
  0x17   : > { %p1189_p2 = pnand %p1187_p1, %p1175_p0  ;;  %s1191_s19 = sshll.u32 %s1283_s18, 4  ;;  %s1192_s19 = int_to_ptr.vmem [resolvable:$false] %s1191_s19 }
  0x18   : > { %s1193_s21 = scalar_lea.vmem %s1192_s19, 8192  ;;  %p1194_p5 = scmp.lt.s32.totalorder %s174_s8, %s1192_s19 }
  0x19   : > { %p1190_p3 = pneg %p1189_p2  ;;  %p1195_p6 = scmp.lt.s32.totalorder %s1193_s21, %s1186_s11 }
  0x1b   : > { %p1196_p7 = por %p1195_p6, %p1194_p5 }
  0x1d   : > { %p1197_p10 = pnand %p1196_p7, %p1190_p3 }
  0x1f   : > { %1200 = shalt.err (!%p1197_p10)
}
  0x20   : > { %s1284_s22 = smov 512   ;;  %s1285_s23 = smov 64  }
  0x21   : > { %s1286_s28 = smov 4   ;;  %p855_p4 = scmp.ge.s32.totalorder %s1281_s17, 1 }
  0x22   : > { %1075 = dma.hbm_to_vmem [thread:$0]  (!%p1384_p13), %s172_s6, 4096, %s174_s8, %s161_s10, %s1284_s22, %s1285_s23, %s1286_s28  }
  0x23   : > { %p181_p12 = scmp.lt.s32.totalorder %s1281_s17, 9 }
  0x25   : > { %p182_p0 = pnand %p855_p4, %p181_p12 }
  0x26   : > { %s1395_s29 = sand.u32 (!%p182_p0), 1, %s1265_s13  }
  0x27   : > { %185 = sbr.rel (%p182_p0) target bundleno = 333 (0x14d), region = 32  ;;  %s856_s30 = sshll.u32 (!%p182_p0), %s1395_s29, 8 }
  0x28   : > { %s188_s4 = scalar_lea.sflag (!%p182_p0), [#allocation4], %s1395_s29  ;;  %s1399_s5 = scalar_lea.vmem (!%p182_p0), [#allocation3], %s856_s30 }
  0x2c   : > { %1252 = dma.done.wait (%p1361_p8), %s188_s4, 4096  }
  0x2d   : > { %1254 = vsyncadd (%p1361_p8), %s188_s4, 4294963200  ;;  %v1287_v0 = vmov 0.0   ;;  %vm1288_vm0 = vmmov 0   ;;  %v1289_v1 = vmov 0   ;;  %v1140_v2 = vld [vmem:[%s1399_s5 + $0x38] sm:$0xff]   ;;  %v1142_v4 = vld [vmem:[%s1399_s5 + $0x30] sm:$0xff]  }
  0x2e   : > { %988 = vmatprep.subr.bf16.mxu0 %v1287_v0  ;;  %1008 = vmatprep.subr.bf16.mxu1 %v1287_v0  ;;  %v1141_v3 = vld [vmem:[%s1399_s5 + $0x78] sm:$0xff]   ;;  %v1143_v5 = vld [vmem:[%s1399_s5 + $0x70] sm:$0xff]   ;;  %v1144_v6 = vld [vmem:[%s1399_s5 + $0x28] sm:$0xff]   ;;  %s857_s11 = sshll.u32 %s1395_s29, 3  ;;  %s942_s21 = sshll.u32 %s1273_s15, 6 }
  0x2f   : > { %1004 = vmatprep.mubr.msk.bf16.mxu0 %vm1288_vm0, %v1287_v0  ;;  %1024 = vmatprep.mubr.msk.bf16.mxu1 %vm1288_vm0, %v1287_v0  ;;  %v1145_v7 = vld [vmem:[%s1399_s5 + $0x68] sm:$0xff]   ;;  %v1146_v8 = vld [vmem:[%s1399_s5 + $0x20] sm:$0xff]   ;;  %v1148_v10 = vld [vmem:[%s1399_s5 + $0x18] sm:$0xff]   ;;  %s217_s18 = scalar_lea.vmem [#allocation6], %s857_s11  ;;  %s1493_s28 = scalar_lea.hbm %s1543_s3, %s942_s21 }
  0x30   : > { %1139 = vset.pattern.permute.xlu0 %v1289_v1  ;;  %989 = vmatpush3.bf16.msra.mxu0 %v1140_v2  ;;  %v1147_v9 = vld [vmem:[%s1399_s5 + $0x60] sm:$0xff]   ;;  %v1149_v11 = vld [vmem:[%s1399_s5 + $0x58] sm:$0xff]   ;;  %v1150_v12 = vld [vmem:[%s1399_s5 + $0x10] sm:$0xff]   ;;  %s750_s19 = sshll.u32 %s217_s18, 4  ;;  %s738_s30 = scalar_lea.sflag [#allocation5], %s1395_s29  ;;  %s1488_s19 = int_to_ptr.vmem [resolvable:$true] %s750_s19 }
  0x31   : > { %1009 = vmatpush3.bf16.msra.mxu1 %v1141_v3  ;;  %990 = vmatprep.subr.bf16.mxu0 %v1287_v0  ;;  %v1151_v13 = vld [vmem:[%s1399_s5 + $0x50] sm:$0xff]   ;;  %v1152_v14 = vld [vmem:[%s1399_s5 + $0x8] sm:$0xff]   ;;  %v1154_v16 = vld [vmem:[%s1399_s5] sm:$0xff]   ;;  %s1201_s4 = scalar_lea.vmem %s1488_s19, 128  ;;  %s1290_s15 = smov [#allocation6]  }
  0x32   : > { %1010 = vmatprep.subr.bf16.mxu1 %v1287_v0  ;;  %v1153_v15 = vld [vmem:[%s1399_s5 + $0x48] sm:$0xff]   ;;  %v1155_v17 = vld [vmem:[%s1399_s5 + $0x40] sm:$0xff]   ;;  %v1157_v19 = vld [vmem:[%s1399_s5 + $0xb8] sm:$0xff]   ;;  %p1202_p8 = scmp.ne.s32.totalorder %s1488_s19, %s1201_s4 }
  0x33   : > { %v1156_v18 = vld [vmem:[%s1541_s1] sm:$0xff]   ;;  %v1158_v20 = vld [vmem:[%s1399_s5 + $0xf8] sm:$0xff]   ;;  %v1159_v21 = vld [vmem:[%s1399_s5 + $0xb0] sm:$0xff]  }
  0x34   : > { %991 = vmatpush3.bf16.msra.mxu0 %v1142_v4  ;;  %v711_v22 = vld [vmem:[%s1542_s2] sm:$0xff]  ;;  %v1160_v23 = vld [vmem:[%s1399_s5 + $0xf0] sm:$0xff]   ;;  %v1161_v24 = vld [vmem:[%s1399_s5 + $0xa8] sm:$0xff]   ;;  %p1203_p13 = pnand %p1202_p8, %p1365_p9 }
  0x35   : > { %1011 = vmatpush3.bf16.msra.mxu1 %v1143_v5  ;;  %992 = vmatprep.subr.bf16.mxu0 %v1287_v0  ;;  %v712_v25 = vld [vmem:[%s1542_s2 + $0x8] sm:$0xff]  ;;  %v1163_v27 = vld [vmem:[%s1399_s5 + $0xa0] sm:$0xff]   ;;  %v1165_v29 = vld [vmem:[%s1399_s5 + $0x98] sm:$0xff]  }
  0x36   : > { %1012 = vmatprep.subr.bf16.mxu1 %v1287_v0  ;;  %715 = vperm.xlu0 %1139, %v711_v22   ;;  %v1162_v26 = vld [vmem:[%s1399_s5 + $0xe8] sm:$0xff]   ;;  %v1164_v28 = vld [vmem:[%s1399_s5 + $0xe0] sm:$0xff]   ;;  %v1166_v30 = vld [vmem:[%s1399_s5 + $0xd8] sm:$0xff]   ;;  %p1204_p1 = pneg %p1203_p13 }
  0x37   : > { %v1167_v31 = vld [vmem:[%s1399_s5 + $0x90] sm:$0xff]   ;;  %v1169_v33 = vld [vmem:[%s1399_s5 + $0x88] sm:$0xff]   ;;  %v1171_v35 = vld [vmem:[%s1399_s5 + $0x80] sm:$0xff]  }
  0x38   : > { %993 = vmatpush3.bf16.msra.mxu0 %v1144_v6  ;;  %v1168_v32 = vld [vmem:[%s1399_s5 + $0xd0] sm:$0xff]   ;;  %v1170_v34 = vld [vmem:[%s1399_s5 + $0xc8] sm:$0xff]   ;;  %v1172_v36 = vld [vmem:[%s1399_s5 + $0xc0] sm:$0xff]   ;;  %s1205_s5 = sshll.u32 %s1290_s15, 4  ;;  %s1206_s5 = int_to_ptr.vmem [resolvable:$false] %s1205_s5 }
  0x39   : > { %1013 = vmatpush3.bf16.msra.mxu1 %v1145_v7  ;;  %994 = vmatprep.subr.bf16.mxu0 %v1287_v0  ;;  %s1207_s24 = scalar_lea.vmem %s1206_s5, 256  ;;  %p1208_p2 = scmp.lt.s32.totalorder %s1488_s19, %s1206_s5 }
  0x3a   : > { %1014 = vmatprep.subr.bf16.mxu1 %v1287_v0  ;;  %720 = vperm.xlu0 %1139, %v712_v25   ;;  %p1209_p3 = scmp.lt.s32.totalorder %s1207_s24, %s1201_s4 }
  0x3c   : > { %995 = vmatpush3.bf16.msra.mxu0 %v1146_v8  ;;  %p1210_p5 = por %p1209_p3, %p1208_p2 }
  0x3d   : > { %1015 = vmatpush3.bf16.msra.mxu1 %v1147_v9  ;;  %996 = vmatprep.subr.bf16.mxu0 %v1287_v0 }
  0x3e   : > { %1016 = vmatprep.subr.bf16.mxu1 %v1287_v0  ;;  %p1211_p6 = pnand %p1210_p5, %p1204_p1 }
  0x40   : > { %997 = vmatpush3.bf16.msra.mxu0 %v1148_v10 }
  0x41   : > { %1017 = vmatpush3.bf16.msra.mxu1 %v1149_v11  ;;  %998 = vmatprep.subr.bf16.mxu0 %v1287_v0 }
  0x42   : > { %1018 = vmatprep.subr.bf16.mxu1 %v1287_v0 }
  0x44   : > { %999 = vmatpush3.bf16.msra.mxu0 %v1150_v12 }
  0x45   : > { %1019 = vmatpush3.bf16.msra.mxu1 %v1151_v13  ;;  %1000 = vmatprep.subr.bf16.mxu0 %v1287_v0 }
  0x46   : > { %1020 = vmatprep.subr.bf16.mxu1 %v1287_v0 }
  0x48   : > { %1001 = vmatpush3.bf16.msra.mxu0 %v1152_v14 }
  0x49   : > { %1021 = vmatpush3.bf16.msra.mxu1 %v1153_v15  ;;  %1002 = vmatprep.subr.bf16.mxu0 %v1287_v0 }
  0x4a   : > { %1022 = vmatprep.subr.bf16.mxu1 %v1287_v0 }
  0x4c   : > { %1003 = vmatpush3.bf16.msra.mxu0 %v1154_v16 }
  0x4d   : > { %1023 = vmatpush3.bf16.msra.mxu1 %v1155_v17  ;;  %1028 = vmatprep.subr.bf16.mxu0 %v1287_v0 }
  0x4e   : > { %1048 = vmatprep.subr.bf16.mxu1 %v1287_v0 }
  0x4f   : > { %1005 = vmatmul.mubr.bf16.vlgmr.msra.gmra.mxu0 %v1156_v18 }
  0x50   : > { %1025 = vmatmul.mubr.bf16.vlgmr.msra.gmra.mxu1 %v1156_v18  ;;  %1029 = vmatpush3.bf16.msra.mxu0 %v1157_v19 }
  0x51   : > { %1049 = vmatpush3.bf16.msra.mxu1 %v1158_v20  ;;  %1030 = vmatprep.subr.bf16.mxu0 %v1287_v0 }
  0x52   : > { %1050 = vmatprep.subr.bf16.mxu1 %v1287_v0  ;;  %1044 = vmatprep.mubr.msk.bf16.mxu0 %vm1288_vm0, %v1287_v0 }
  0x53   : > { %1064 = vmatprep.mubr.msk.bf16.mxu1 %vm1288_vm0, %v1287_v0 }
  0x54   : > { %1031 = vmatpush3.bf16.msra.mxu0 %v1159_v21 }
  0x55   : > { %1051 = vmatpush3.bf16.msra.mxu1 %v1160_v23  ;;  %1032 = vmatprep.subr.bf16.mxu0 %v1287_v0 }
  0x56   : > { %1052 = vmatprep.subr.bf16.mxu1 %v1287_v0 }
  0x58   : > { %1033 = vmatpush3.bf16.msra.mxu0 %v1161_v24 }
  0x59   : > { %1053 = vmatpush3.bf16.msra.mxu1 %v1162_v26  ;;  %1034 = vmatprep.subr.bf16.mxu0 %v1287_v0 }
  0x5a   : > { %1054 = vmatprep.subr.bf16.mxu1 %v1287_v0 }
  0x5c   : > { %1035 = vmatpush3.bf16.msra.mxu0 %v1163_v27 }
  0x5d   : > { %1055 = vmatpush3.bf16.msra.mxu1 %v1164_v28  ;;  %1036 = vmatprep.subr.bf16.mxu0 %v1287_v0 }
  0x5e   : > { %1056 = vmatprep.subr.bf16.mxu1 %v1287_v0 }
  0x60   : > { %1037 = vmatpush3.bf16.msra.mxu0 %v1165_v29 }
  0x61   : > { %1057 = vmatpush3.bf16.msra.mxu1 %v1166_v30  ;;  %1038 = vmatprep.subr.bf16.mxu0 %v1287_v0 }
  0x62   : > { %1058 = vmatprep.subr.bf16.mxu1 %v1287_v0 }
  0x64   : > { %1039 = vmatpush3.bf16.msra.mxu0 %v1167_v31 }
  0x65   : > { %1059 = vmatpush3.bf16.msra.mxu1 %v1168_v32  ;;  %1040 = vmatprep.subr.bf16.mxu0 %v1287_v0 }
  0x66   : > { %1060 = vmatprep.subr.bf16.mxu1 %v1287_v0 }
  0x68   : > { %1041 = vmatpush3.bf16.msra.mxu0 %v1169_v33 }
  0x69   : > { %1061 = vmatpush3.bf16.msra.mxu1 %v1170_v34  ;;  %1042 = vmatprep.subr.bf16.mxu0 %v1287_v0 }
  0x6a   : > { %1062 = vmatprep.subr.bf16.mxu1 %v1287_v0 }
  0x6c   : > { %1043 = vmatpush3.bf16.msra.mxu0 %v1171_v35 }
  0x6d   : > { %1063 = vmatpush3.bf16.msra.mxu1 %v1172_v36 }
  0x6f   : > { %1045 = vmatmul.mubr.bf16.vlgmr.msra.gmra.mxu0 %v1156_v18 }
  0x70   : > { %1065 = vmatmul.mubr.bf16.vlgmr.msra.gmra.mxu1 %v1156_v18 }
  0xb1   : > { %v716_v49 = vpop.permute.xlu0 %715 }
  0xb5   : > { %v721_v61 = vpop.permute.xlu0 %720 }
 0x10f   : > { %v344_v37 = vpop.f32.mrf.mxu0 }
 0x110   : > { %v457_v38 = vpop.f32.mrf.mxu1 }
 0x111   : > { %v1006_v39 = vpop.f32.mrf.mxu0  ;;  %v701_v45 = vmax.f32 %v344_v37, %v457_v38 }
 0x112   : > { %v1026_v40 = vpop.f32.mrf.mxu1 }
 0x113   : > { %v347_v41 = vpop.f32.mrf.mxu0 }
 0x114   : > { %v460_v42 = vpop.f32.mrf.mxu1 }
 0x115   : > { %v1007_v43 = vpop.f32.mrf.mxu0  ;;  %v702_v51 = vmax.f32 %v347_v41, %v460_v42 }
 0x116   : > { %v1027_v44 = vpop.f32.mrf.mxu1 }
 0x12f   : > { %v570_v46 = vpop.f32.mrf.mxu0 }
 0x130   : > { %v705_v47 = vmax.f32 %v701_v45, %v570_v46  ;;  %v683_v48 = vpop.f32.mrf.mxu1 }
 0x131   : > { %v1046_v50 = vpop.f32.mrf.mxu0 }
 0x132   : > { %v709_v52 = vmax.f32 %v705_v47, %v683_v48  ;;  %v1066_v53 = vpop.f32.mrf.mxu1 }
 0x133   : > { %v573_v54 = vpop.f32.mrf.mxu0 }
 0x134   : > { %v706_v55 = vmax.f32 %v702_v51, %v573_v54  ;;  %v686_v56 = vpop.f32.mrf.mxu1  ;;  %v723_v58 = vadd.f32 %v716_v49, %v709_v52 }
 0x135   : > { %v1047_v57 = vpop.f32.mrf.mxu0 }
 0x136   : > { %v710_v59 = vmax.f32 %v706_v55, %v686_v56  ;;  %v1067_v60 = vpop.f32.mrf.mxu1  ;;  %v725_v63 = vmax.f32 %v723_v58, 0.0 }
 0x138   : > { %v724_v62 = vadd.f32 %v721_v61, %v710_v59 }
 0x13a   : > { %v726_v0 = vmax.f32 %v724_v62, 0.0 }
 0x13c   : > { %v950_v1 = vpack.c.bf16 %v726_v0, %v725_v63 }
 0x13e   : > { %951 = vst [vmem:[%s217_s18] sm:$0xff] %v950_v1  }
 0x13f   : > { %1214 = shalt.err (!%p1211_p6)
}
 0x140   : > { %s1215_s6 = scalar_lea.hbm %s1493_s28, 128  ;;  %s1219_s9 = scalar_lea.hbm %s1543_s3, 1024 }
 0x141   : > { %p1216_p7 = scmp.ne.s32.totalorder %s1493_s28, %s1215_s6  ;;  %p1220_p12 = scmp.lt.s32.totalorder %s1493_s28, %s1543_s3 }
 0x142   : > { %p1221_p0 = scmp.lt.s32.totalorder %s1219_s9, %s1215_s6 }
 0x143   : > { %p1217_p10 = pnand %p1216_p7, %p1365_p9 }
 0x144   : > { %p1222_p8 = por %p1221_p0, %p1220_p12 }
 0x145   : > { %p1218_p4 = pneg %p1217_p10 }
 0x147   : > { %p1223_p13 = pnand %p1222_p8, %p1218_p4 }
 0x149   : > { %1226 = shalt.err (!%p1223_p13)
}
 0x14a   : > { %s1291_s18 = smov 64   ;;  %s1292_s21 = smov 512  }
 0x14b   : > { %s1293_s22 = smov 4  }
 0x14c   : > { %1070 = dma.vmem_to_hbm [thread:$0]  (%p1365_p9), %s1488_s19, 128, %s1493_s28, %s738_s30, %s1291_s18, %s1292_s21, %s1293_s22  }
 0x14d PF: > { %p1081_p1 = scmp.ge.s32.totalorder %s1281_s17, 2  ;;  %s765_s23 = sand.u32 1, %s1261_s12  }
 0x14e   : > { %s766_s4 = scalar_lea.sflag [#allocation5], %s765_s23 }
 0x14f   : > { %p1077_p2 = pnand %p1081_p1, %p1372_p11 }
 0x151   : > { %p1078_p3 = pneg %p1077_p2 }
 0x153   : > { %1256 = dma.done.wait (%p1078_p3), %s766_s4, 128  }
 0x154   : > { %1258 = vsyncadd (%p1078_p3), %s766_s4, 4294967168  ;;  %s19_s17 = sadd.s32 1, %s1281_s17   ;;  %s1549_s12 = smov %s1265_s13 }
 0x155   : > { %p16_p5 = scmp.ge.s32.totalorder %s19_s17, 10   ;;  %s1550_s13 = smov %s1269_s14 }
 0x156   : > { %s1551_s14 = smov %s1370_s26  ;;  %s1552_s15 = smov %s1277_s16 }
 0x157   : > { %s1553_s16 = smov %s1555_s20  ;;  %18 = sbr.rel (!%p16_p5) target bundleno = 6 (0x6), region = 94 }
 0x15c   :  { %771 = vsyncpa [#allocation4], 1 }
 0x15d   :  { %773 = vsyncpa [#allocation4 + $0x1], 1 }
 0x15e   :  { %774 = vsyncpa [#allocation5], 1 }
 0x15f   :  { %776 = vsyncpa [#allocation5 + $0x1], 1 }

</bundles_post_ra>
